<compile_context>
chip_gen: v7x
topology: tpu7x:2x2x1
jax: 0.10.0
libtpu: 0.0.40
codegen_flags: <defaults>
</compile_context>

<pallas_src>
import functools

import jax
import jax.numpy as jnp
from jax.experimental import pallas as pl
from jax.experimental.pallas import tpu as pltpu

HIDDEN = 512


def _round_up(a, m):
    return (a + m - 1) // m * m


def head_kernel(x_ref, w1_ref, b1_ref, w2_ref, b2_ref, o_ref, acc_ref, *, inv_hw):
    # Grid: (batch_blocks, spatial_blocks); spatial is the reduction axis.
    s = pl.program_id(1)

    @pl.when(s == 0)
    def _():
        acc_ref[...] = jnp.zeros_like(acc_ref)

    # Partial global-average-pool: accumulate spatial sums (scale applied once
    # at finalize).  Zero-padded spatial columns contribute nothing.
    acc_ref[...] += jnp.sum(x_ref[...], axis=-1)        # (TB, C)

    @pl.when(s == pl.num_programs(1) - 1)
    def _():
        pooled = acc_ref[...] * inv_hw                  # (TB, C)
        h = jnp.dot(pooled, w1_ref[...],
                    preferred_element_type=jnp.float32) + b1_ref[...]   # (TB, 512)
        h = jnp.maximum(h, 0.0)
        out = jnp.dot(h, w2_ref[...],
                      preferred_element_type=jnp.float32) + b2_ref[...]  # (TB, OUT_PAD)
        o_ref[...] = out.astype(o_ref.dtype)


def multilabel_classification_head(x_nchw, w1, b1, w2, b2):
    """x_nchw: (B, C, H, W) f32.  w1: (C, 512), b1: (1, 512),
    w2: (512, num_labels), b2: (1, num_labels)."""
    B, C, H, W = x_nchw.shape
    num_labels = w2.shape[1]
    S = H * W

    # ---- Tile sizing -------------------------------------------------------
    budget = 4 << 20                                   # per-buffer x-tile bytes
    ts_blocks = min(pl.cdiv(S, 128), 4)                # spatial tile <= 512 lanes
    while ts_blocks > 1 and 8 * C * (ts_blocks * 128) * 4 > budget:
        ts_blocks -= 1
    TS = ts_blocks * 128

    TB = budget // (C * TS * 4)
    TB = max(8, min(128, (TB // 8) * 8))               # multiple of 8, <=128 rows
    TB = min(TB, _round_up(B, 8))

    B_pad = _round_up(B, TB)
    S_pad = _round_up(S, TS)
    OUT_PAD = _round_up(max(num_labels, 128), 128)     # lane-dense output store

    # ---- Pad operands (zero padding never changes the pooled sum) ----------
    x3 = x_nchw.reshape(B, C, S)
    x3 = jnp.pad(x3, ((0, B_pad - B), (0, 0), (0, S_pad - S)))
    w2p = jnp.pad(w2, ((0, 0), (0, OUT_PAD - num_labels)))
    b2p = jnp.pad(b2, ((0, 0), (0, OUT_PAD - num_labels)))

    grid = (B_pad // TB, S_pad // TS)

    # ---- VMEM budget: 2x x-tile (double buffer) + resident weights + out ---
    x_tile_bytes = TB * C * TS * 4
    w_bytes = (C * HIDDEN + HIDDEN + HIDDEN * OUT_PAD + OUT_PAD) * 4
    out_tile_bytes = TB * OUT_PAD * 4
    acc_bytes = _round_up(TB, 8) * _round_up(C, 128) * 4
    vmem_need = 2 * x_tile_bytes + 2 * w_bytes + 2 * out_tile_bytes + acc_bytes
    vmem_limit = int(min(max(2 * vmem_need, 16 << 20), 48 << 20))

    out_full = pl.pallas_call(
        functools.partial(head_kernel, inv_hw=1.0 / float(S)),
        out_shape=jax.ShapeDtypeStruct((B_pad, OUT_PAD), jnp.float32),
        grid=grid,
        in_specs=[
            pl.BlockSpec((TB, C, TS), lambda b, s: (b, 0, s)),
            pl.BlockSpec((C, HIDDEN), lambda b, s: (0, 0)),       # VMEM-resident
            pl.BlockSpec((1, HIDDEN), lambda b, s: (0, 0)),
            pl.BlockSpec((HIDDEN, OUT_PAD), lambda b, s: (0, 0)),
            pl.BlockSpec((1, OUT_PAD), lambda b, s: (0, 0)),
        ],
        out_specs=pl.BlockSpec((TB, OUT_PAD), lambda b, s: (b, 0)),
        scratch_shapes=[pltpu.VMEM((TB, C), jnp.float32)],
        compiler_params=pltpu.CompilerParams(
            dimension_semantics=("parallel", "arbitrary"),
            vmem_limit_bytes=vmem_limit),
    )(x3, w1, b1, w2p, b2p)

    return out_full[:B, :num_labels]


def reference(x_nchw, w1, b1, w2, b2):
    pooled = jnp.mean(x_nchw, axis=(2, 3))
    h = jnp.maximum(pooled @ w1 + b1, 0.0)
    return h @ w2 + b2


def _run_case(key, B, C, H, W, num_labels):
    kx, kw1, kb1, kw2, kb2 = jax.random.split(key, 5)
    x = jax.random.normal(kx, (B, C, H, W), dtype=jnp.float32)
    w1 = jax.random.normal(kw1, (C, HIDDEN), dtype=jnp.float32) * 0.1
    b1 = jax.random.normal(kb1, (1, HIDDEN), dtype=jnp.float32) * 0.01
    w2 = jax.random.normal(kw2, (HIDDEN, num_labels), dtype=jnp.float32) * 0.1
    b2 = jax.random.normal(kb2, (1, num_labels), dtype=jnp.float32) * 0.01

    out = multilabel_classification_head(x, w1, b1, w2, b2)
    out = jax.block_until_ready(out)
    ref = reference(x, w1, b1, w2, b2)
    assert out.shape == (B, num_labels), out.shape
    assert jnp.allclose(out, ref, atol=1e-4, rtol=1e-4), (out, ref)


if __name__ == "__main__":
    key = jax.random.PRNGKey(0)
    k0, k1 = jax.random.split(key)

    # Primary small case matching the module spec.
    _run_case(k0, B=2, C=4, H=16, W=16, num_labels=2)
    # Second case exercising the multi-step spatial accumulation path.
    _run_case(k1, B=4, C=8, H=24, W=24, num_labels=2)

    print("KERNEL_OK")
</pallas_src>

<mosaic_0001>
module attributes {stable_mosaic.version = 11 : i64} {
  func.func @head_kernel(%arg0: i32, %arg1: i32, %arg2: memref<8x4x256xf32, #tpu.memory_space<vmem>>, %arg3: memref<4x512xf32, #tpu.memory_space<vmem>>, %arg4: memref<1x512xf32, #tpu.memory_space<vmem>>, %arg5: memref<512x128xf32, #tpu.memory_space<vmem>>, %arg6: memref<1x128xf32, #tpu.memory_space<vmem>>, %arg7: memref<8x128xf32, #tpu.memory_space<vmem>>, %arg8: memref<8x4xf32, #tpu.memory_space<vmem>>) attributes {dimension_semantics = [#tpu.dimension_semantics<parallel>, #tpu.dimension_semantics<arbitrary>], iteration_bounds = array<i64: 1, 1>, scalar_prefetch = 0 : i64, scratch_operands = 1 : i64, tpu.core_type = #tpu.core_type<tc>, window_params = [{transform_indices = @transform_0, window_bounds = array<i64: 8, 4, 256>}, {pipeline_mode = #tpu.pipeline_mode<synchronous>, transform_indices = @transform_1, window_bounds = array<i64: 4, 512>}, {pipeline_mode = #tpu.pipeline_mode<synchronous>, transform_indices = @transform_2, window_bounds = array<i64: 1, 512>}, {pipeline_mode = #tpu.pipeline_mode<synchronous>, transform_indices = @transform_3, window_bounds = array<i64: 512, 128>}, {pipeline_mode = #tpu.pipeline_mode<synchronous>, transform_indices = @transform_4, window_bounds = array<i64: 1, 128>}, {transform_indices = @transform_5, window_bounds = array<i64: 8, 128>}]} {
    %c0_i32 = arith.constant 0 : i32
    %0 = arith.cmpi eq, %arg1, %c0_i32 : i32
    %1 = arith.extui %0 : i1 to i32
    %c0_i32_0 = arith.constant 0 : i32
    %2 = arith.cmpi ne, %1, %c0_i32_0 : i32
    scf.if %2 {
      %cst_9 = arith.constant 0.000000e+00 : f32
      %11 = vector.broadcast %cst_9 : f32 to vector<8x4xf32>
      %c0_10 = arith.constant 0 : index
      %c0_11 = arith.constant 0 : index
      %12 = vector.load %arg8[%c0_10, %c0_11] : memref<8x4xf32, #tpu.memory_space<vmem>>, vector<8x4xf32>
      tpu.vector_store %arg8[%c0_10, %c0_11], %11 {strides = array<i32>} : memref<8x4xf32, #tpu.memory_space<vmem>>, vector<8x4xf32>,
    } else {
    }
    %c0 = arith.constant 0 : index
    %c0_1 = arith.constant 0 : index
    %3 = vector.load %arg8[%c0, %c0_1] : memref<8x4xf32, #tpu.memory_space<vmem>>, vector<8x4xf32>
    %c0_2 = arith.constant 0 : index
    %c0_3 = arith.constant 0 : index
    %c0_4 = arith.constant 0 : index
    %4 = vector.load %arg2[%c0_2, %c0_3, %c0_4] : memref<8x4x256xf32, #tpu.memory_space<vmem>>, vector<8x4x256xf32>
    %cst = arith.constant dense<0.000000e+00> : vector<8x4xf32>
    %5 = vector.multi_reduction <add>, %4, %cst [2] : vector<8x4x256xf32> to vector<8x4xf32>
    %6 = arith.addf %3, %5 : vector<8x4xf32>
    %c0_5 = arith.constant 0 : index
    %c0_6 = arith.constant 0 : index
    %7 = vector.load %arg8[%c0_5, %c0_6] : memref<8x4xf32, #tpu.memory_space<vmem>>, vector<8x4xf32>
    tpu.vector_store %arg8[%c0_5, %c0_6], %6 {strides = array<i32>} : memref<8x4xf32, #tpu.memory_space<vmem>>, vector<8x4xf32>,
    %c0_i32_7 = arith.constant 0 : i32
    %8 = arith.cmpi eq, %arg1, %c0_i32_7 : i32
    %9 = arith.extui %8 : i1 to i32
    %c0_i32_8 = arith.constant 0 : i32
    %10 = arith.cmpi ne, %9, %c0_i32_8 : i32
    scf.if %10 {
      %c0_9 = arith.constant 0 : index
      %c0_10 = arith.constant 0 : index
      %11 = vector.load %arg8[%c0_9, %c0_10] : memref<8x4xf32, #tpu.memory_space<vmem>>, vector<8x4xf32>
      %cst_11 = arith.constant 3.906250e-03 : f32
      %12 = vector.broadcast %cst_11 : f32 to vector<8x4xf32>
      %13 = arith.mulf %11, %12 : vector<8x4xf32>
      %c0_12 = arith.constant 0 : index
      %c0_13 = arith.constant 0 : index
      %14 = vector.load %arg3[%c0_12, %c0_13] : memref<4x512xf32, #tpu.memory_space<vmem>>, vector<4x512xf32>
      %cst_14 = arith.constant dense<0.000000e+00> : vector<8x512xf32>
      %15 = tpu.matmul %13, %14, %cst_14 {dimension_numbers = #tpu.dot_dimension_numbers<[1], [0], [0], [1], [0, 0, 1, 1], [], []>} : vector<8x4xf32>, vector<4x512xf32>, vector<8x512xf32> -> vector<8x512xf32>
      %c0_15 = arith.constant 0 : index
      %c0_16 = arith.constant 0 : index
      %16 = vector.load %arg4[%c0_15, %c0_16] : memref<1x512xf32, #tpu.memory_space<vmem>>, vector<1x512xf32>
      %17 = vector.broadcast %16 : vector<1x512xf32> to vector<8x512xf32>
      %18 = arith.addf %15, %17 : vector<8x512xf32>
      %cst_17 = arith.constant 0.000000e+00 : f32
      %19 = vector.broadcast %cst_17 : f32 to vector<8x512xf32>
      %20 = arith.maximumf %18, %19 : vector<8x512xf32>
      %c0_18 = arith.constant 0 : index
      %c0_19 = arith.constant 0 : index
      %21 = vector.load %arg5[%c0_18, %c0_19] : memref<512x128xf32, #tpu.memory_space<vmem>>, vector<512x128xf32>
      %cst_20 = arith.constant dense<0.000000e+00> : vector<8x128xf32>
      %22 = tpu.matmul %20, %21, %cst_20 {dimension_numbers = #tpu.dot_dimension_numbers<[1], [0], [0], [1], [0, 0, 1, 1], [], []>} : vector<8x512xf32>, vector<512x128xf32>, vector<8x128xf32> -> vector<8x128xf32>
      %c0_21 = arith.constant 0 : index
      %c0_22 = arith.constant 0 : index
      %23 = vector.load %arg6[%c0_21, %c0_22] : memref<1x128xf32, #tpu.memory_space<vmem>>, vector<1x128xf32>
      %24 = vector.broadcast %23 : vector<1x128xf32> to vector<8x128xf32>
      %25 = arith.addf %22, %24 : vector<8x128xf32>
      %c0_23 = arith.constant 0 : index
      %c0_24 = arith.constant 0 : index
      %26 = vector.load %arg7[%c0_23, %c0_24] : memref<8x128xf32, #tpu.memory_space<vmem>>, vector<8x128xf32>
      tpu.vector_store %arg7[%c0_23, %c0_24], %25 {strides = array<i32>} : memref<8x128xf32, #tpu.memory_space<vmem>>, vector<8x128xf32>,
    } else {
    }
    return
  }
  func.func @transform_0(%arg0: i32, %arg1: i32) -> (i32, i32, i32) {
    %c0_i32 = arith.constant 0 : i32
    %c0_i32_0 = arith.constant 0 : i32
    return %arg0, %c0_i32, %arg1 : i32, i32, i32
  }
  func.func @transform_1(%arg0: i32, %arg1: i32) -> (i32, i32) {
    %c0_i32 = arith.constant 0 : i32
    %c0_i32_0 = arith.constant 0 : i32
    %c0_i32_1 = arith.constant 0 : i32
    return %c0_i32, %c0_i32_0 : i32, i32
  }
  func.func @transform_2(%arg0: i32, %arg1: i32) -> (i32, i32) {
    %c0_i32 = arith.constant 0 : i32
    %c0_i32_0 = arith.constant 0 : i32
    %c0_i32_1 = arith.constant 0 : i32
    return %c0_i32, %c0_i32_0 : i32, i32
  }
  func.func @transform_3(%arg0: i32, %arg1: i32) -> (i32, i32) {
    %c0_i32 = arith.constant 0 : i32
    %c0_i32_0 = arith.constant 0 : i32
    %c0_i32_1 = arith.constant 0 : i32
    return %c0_i32, %c0_i32_0 : i32, i32
  }
  func.func @transform_4(%arg0: i32, %arg1: i32) -> (i32, i32) {
    %c0_i32 = arith.constant 0 : i32
    %c0_i32_0 = arith.constant 0 : i32
    %c0_i32_1 = arith.constant 0 : i32
    return %c0_i32, %c0_i32_0 : i32, i32
  }
  func.func @transform_5(%arg0: i32, %arg1: i32) -> (i32, i32) {
    %c0_i32 = arith.constant 0 : i32
    %c0_i32_0 = arith.constant 0 : i32
    return %arg0, %c0_i32 : i32, i32
  }
}

</mosaic_0001>

<bundles_post_ra>
// kernel: tpu_custom_call.1
= control target key start
LH: loop header
LB: loop body
LE: loop exit
PB: predicated region body
PF: predicated region fallthrough
CT: control target
= control target key end

     0   :  { %10 = vsyncpa [#allocation4], 0  ;;  %s999_s0 = inlined_call_operand.hbm [shape: f32[8,4,256], index: 0, kind: input, shape index: {}]   ;;  %s1000_s1 = inlined_call_operand.hbm [shape: f32[4,512], index: 1, kind: input, shape index: {}]   ;;  %s1001_s2 = inlined_call_operand.vmem [shape: f32[1,512], index: 2, kind: input, shape index: {}]   ;;  %s1002_s3 = inlined_call_operand.hbm [shape: f32[512,128], index: 3, kind: input, shape index: {}]   ;;  %s1003_s4 = inlined_call_operand.vmem [shape: f32[1,128], index: 4, kind: input, shape index: {}]   ;;  %s1004_s5 = inlined_call_operand.hbm [shape: f32[8,128], index: 5, kind: output, shape index: {}]  }
   0x1   :  { %11 = vsyncpa [#allocation7], 0 }
   0x2   :  { %12 = vsyncpa [#allocation5], 0  ;;  %s870_s18 = smov [#allocation6]   ;;  %s871_s20 = smov [#allocation3]  }
   0x3   :  { %s31_s19 = sshll.u32 %s870_s18, 4  ;;  %s18_s21 = sshll.u32 %s871_s20, 4  ;;  %s32_s19 = int_to_ptr.vmem [resolvable:$true] %s31_s19  ;;  %s907_s21 = int_to_ptr.vmem [resolvable:$true] %s18_s21 }
   0x4   :  { %s776_s24 = scalar_lea.hbm %s1000_s1, 256 }
   0x5   :  { %p777_p0 = scmp.ne.s32.totalorder %s1000_s1, %s776_s24  ;;  %p780_p1 = scmp.lt.u32.totalorder %s776_s24, %s1000_s1 }
   0x7   :  { %p782_p2 = pnand %p780_p1, %p777_p0 }
   0x9   :  { %785 = shalt.err (!%p782_p2)
}
   0xa   :  { %s786_s29 = scalar_lea.vmem %s32_s19, 256  ;;  %p791_p4 = scmp.lt.s32.totalorder %s32_s19, %s32_s19 }
   0xb   :  { %p787_p3 = scmp.ne.s32.totalorder %s32_s19, %s786_s29  ;;  %p792_p5 = scmp.lt.s32.totalorder %s786_s29, %s786_s29 }
   0xd   :  { %p793_p6 = por %p792_p5, %p791_p4 }
   0xf   :  { %p794_p7 = pnand %p793_p6, %p787_p3 }
  0x11   :  { %797 = shalt.err (!%p794_p7)
}
  0x12   :  { %34 = dma.hbm_to_vmem [thread:$0]  %s1000_s1, 256, %s32_s19, [#allocation7]  }
  0x13   :  { %s798_s9 = scalar_lea.hbm %s999_s0, 1024 }
  0x14   :  { %p799_p8 = scmp.ne.s32.totalorder %s999_s0, %s798_s9  ;;  %p802_p9 = scmp.lt.u32.totalorder %s798_s9, %s999_s0 }
  0x16   :  { %p804_p10 = pnand %p802_p9, %p799_p8 }
  0x18   :  { %807 = shalt.err (!%p804_p10)
}
  0x19   :  { %s808_s14 = scalar_lea.vmem %s907_s21, 1024  ;;  %p813_p12 = scmp.lt.s32.totalorder %s907_s21, %s907_s21 }
  0x1a   :  { %p809_p11 = scmp.ne.s32.totalorder %s907_s21, %s808_s14  ;;  %p814_p13 = scmp.lt.s32.totalorder %s808_s14, %s808_s14 }
  0x1c   :  { %p815_p0 = por %p814_p13, %p813_p12 }
  0x1e   :  { %p816_p1 = pnand %p815_p0, %p809_p11 }
  0x20   :  { %819 = shalt.err (!%p816_p1)
}
  0x21   :  { %s872_s1 = smov 128   ;;  %s873_s15 = smov 8  }
  0x22   :  { %24 = dma.hbm_to_vmem [thread:$0]  %s999_s0, 1024, %s907_s21, [#allocation4], %s872_s1, %s872_s1, %s873_s15  }
  0x23   :  { %s874_s18 = smov [#allocation8]   ;;  %s820_s23 = scalar_lea.hbm %s1002_s3, 8192 }
  0x24   :  { %s42_s19 = sshll.u32 %s874_s18, 4  ;;  %p821_p2 = scmp.ne.s32.totalorder %s1002_s3, %s820_s23  ;;  %s43_s19 = int_to_ptr.vmem [resolvable:$true] %s42_s19 }
  0x25   :  { %p824_p3 = scmp.lt.u32.totalorder %s820_s23, %s1002_s3 }
  0x27   :  { %p826_p4 = pnand %p824_p3, %p821_p2 }
  0x29   :  { %829 = shalt.err (!%p826_p4)
}
  0x2a   :  { %s830_s28 = scalar_lea.vmem %s43_s19, 8192  ;;  %p835_p6 = scmp.lt.s32.totalorder %s43_s19, %s43_s19 }
  0x2b   :  { %p831_p5 = scmp.ne.s32.totalorder %s43_s19, %s830_s28  ;;  %p836_p7 = scmp.lt.s32.totalorder %s830_s28, %s830_s28 }
  0x2d   :  { %p837_p8 = por %p836_p7, %p835_p6 }
  0x2f   :  { %p838_p9 = pnand %p837_p8, %p831_p5 }
  0x31   :  { %841 = shalt.err (!%p838_p9)
}
  0x32   :  { %48 = dma.hbm_to_vmem [thread:$0]  %s1002_s3, 8192, %s43_s19, [#allocation7], %s872_s1, %s872_s1, %s873_s15  }
  0x33   :  { %864 = dma.done.wait [#allocation4], 1024  }
  0x34   :  { %865 = vsyncadd [#allocation4], 4294966272 }
  0x35   :  { %866 = dma.done.wait [#allocation7], 8448  }
  0x36   :  { %867 = vsyncadd [#allocation7], 4294958848  ;;  %vm99_vm0 = vcmask 1043456   ;;  %v67_v0 = vld [vmem:[#allocation3] sm:$0xff]  ;;  %v69_v1 = vld [vmem:[#allocation3 + $0x10] sm:$0xff]  ;;  %vm64_vm1 = vcmask 31744   ;;  %v148_v51 = vlaneseq }
  0x37   :  { %v68_v2 = vld [vmem:[#allocation3 + $0x8] sm:$0xff]  ;;  %v83_v3 = vcombine.high %v67_v0, %v67_v0  ;;  %v100_v4 = vsel %vm99_vm0, %v67_v0, 0.0  ;;  %v85_v5 = vcombine.high %v69_v1, %v69_v1  ;;  %v110_v6 = vsel %vm99_vm0, %v69_v1, 0.0  ;;  %v70_v7 = vld [vmem:[#allocation3 + $0x18] sm:$0xff]  ;;  %v71_v8 = vld [vmem:[#allocation3 + $0x20] sm:$0xff]  ;;  %s876_s6 = smov [#allocation9]  }
  0x38   :  { %v84_v9 = vcombine.high %v68_v2, %v68_v2  ;;  %v105_v10 = vsel %vm99_vm0, %v68_v2, 0.0  ;;  %v86_v11 = vcombine.high %v70_v7, %v70_v7  ;;  %v72_v12 = vld [vmem:[#allocation3 + $0x28] sm:$0xff]  ;;  %v115_v15 = vsel %vm99_vm0, %v70_v7, 0.0  ;;  %v73_v21 = vld [vmem:[#allocation3 + $0x30] sm:$0xff]  ;;  %v74_v22 = vld [vmem:[#allocation3 + $0x38] sm:$0xff]  ;;  %s608_s7 = sshll.u32 %s876_s6, 4  ;;  %s609_s7 = int_to_ptr.vmem [resolvable:$true] %s608_s7 }
  0x39   :  { %v101_v13 = vsel %vm99_vm0, %v83_v3, 0.0  ;;  %v111_v14 = vsel %vm99_vm0, %v85_v5, 0.0  ;;  %v87_v16 = vcombine.high %v71_v8, %v71_v8  ;;  %v88_v23 = vcombine.high %v72_v12, %v72_v12  ;;  %v205_v41 = vld [vmem:[#allocation6] sm:$0xff]  ;;  %v206_v42 = vld [vmem:[#allocation6 + $0x8] sm:$0xff]  ;;  %v406_v45 = vld [vmem:[#allocation8 + $0x80] sm:$0xff]  ;;  %s842_s8 = scalar_lea.vmem %s609_s7, 128  ;;  %p847_p11 = scmp.lt.s32.totalorder %s609_s7, %s609_s7 }
  0x3a   :  { %v102_v17 = vadd.f32 %v101_v13, %v100_v4  ;;  %v112_v18 = vadd.f32 %v111_v14, %v110_v6  ;;  %v106_v19 = vsel %vm99_vm0, %v84_v9, 0.0  ;;  %v116_v20 = vsel %vm99_vm0, %v86_v11, 0.0  ;;  %v407_v46 = vld [vmem:[#allocation8 + $0x88] sm:$0xff]  ;;  %v438_v47 = vld [vmem:[#allocation8 + $0x180] sm:$0xff]  ;;  %p843_p10 = scmp.ne.s32.totalorder %s609_s7, %s842_s8  ;;  %p848_p12 = scmp.lt.s32.totalorder %s842_s8, %s842_s8 }
  0x3b   :  { %v107_v24 = vadd.f32 %v106_v19, %v105_v10  ;;  %v117_v25 = vadd.f32 %v116_v20, %v115_v15  ;;  %v120_v26 = vsel %vm99_vm0, %v71_v8, 0.0  ;;  %v121_v27 = vsel %vm99_vm0, %v87_v16, 0.0  ;;  %v439_v49 = vld [vmem:[#allocation8 + $0x188] sm:$0xff]  ;;  %v390_v16 = vld [vmem:[#allocation8] sm:$0xff]  ;;  %v408_v20 = vld [vmem:[#allocation8 + $0x90] sm:$0xff] }
  0x3c   :  { %103 = vadd.xlane.f32.xlu0 %v102_v17  ;;  %113 = vadd.xlane.f32.xlu1 %v112_v18  ;;  %v125_v28 = vsel %vm99_vm0, %v72_v12, 0.0  ;;  %v126_v29 = vsel %vm99_vm0, %v88_v23, 0.0  ;;  %v89_v30 = vcombine.high %v73_v21, %v73_v21  ;;  %v90_v31 = vcombine.high %v74_v22, %v74_v22  ;;  %v391_v17 = vld [vmem:[#allocation8 + $0x8] sm:$0xff]  ;;  %v422_v18 = vld [vmem:[#allocation8 + $0x100] sm:$0xff]  ;;  %v441_v23 = vld [vmem:[#allocation8 + $0x198] sm:$0xff]  ;;  %p849_p13 = por %p848_p12, %p847_p11 }
  0x3d   :  { %v122_v32 = vadd.f32 %v121_v27, %v120_v26  ;;  %v127_v33 = vadd.f32 %v126_v29, %v125_v28  ;;  %v130_v34 = vsel %vm99_vm0, %v73_v21, 0.0  ;;  %v135_v36 = vsel %vm99_vm0, %v74_v22, 0.0  ;;  %v423_v19 = vld [vmem:[#allocation8 + $0x108] sm:$0xff]  ;;  %v409_v21 = vld [vmem:[#allocation8 + $0x98] sm:$0xff]  ;;  %v440_v22 = vld [vmem:[#allocation8 + $0x190] sm:$0xff] }
  0x3e   :  { %v131_v35 = vsel %vm99_vm0, %v89_v30, 0.0  ;;  %v136_v37 = vsel %vm99_vm0, %v90_v31, 0.0  ;;  %v875_v40 = vmov 0.0   ;;  %v231_v43 = vcombine.high %v205_v41, %v205_v41  ;;  %v392_v27 = vld [vmem:[#allocation8 + $0x10] sm:$0xff]  ;;  %v393_v28 = vld [vmem:[#allocation8 + $0x18] sm:$0xff]  ;;  %p850_p0 = pnand %p849_p13, %p843_p10 }
  0x3f   :  { %v132_v38 = vadd.f32 %v131_v35, %v130_v34  ;;  %v137_v39 = vadd.f32 %v136_v37, %v135_v36  ;;  %308 = vmatprep.mubr.f32.mxu0 %v875_v40  ;;  %379 = vmatprep.mubr.f32.mxu1 %v875_v40  ;;  %65 = vst.msk [vmem:[#allocation2] sm:$0xff] %vm64_vm1, %v875_v40  ;;  %v149_v52 = vand.u32 127, %v148_v51  ;;  %v971_v53 = vshrl.u32 %v148_v51, 7  ;;  %v410_v34 = vld [vmem:[#allocation8 + $0xa0] sm:$0xff]  ;;  %v411_v35 = vld [vmem:[#allocation8 + $0xa8] sm:$0xff] }
  0x40   :  { %108 = vadd.xlane.f32.xlu0 %v107_v24  ;;  %118 = vadd.xlane.f32.xlu1 %v117_v25  ;;  %v232_v44 = vcombine.high %v206_v42, %v206_v42  ;;  %v695_v48 = vpack.c.bf16 %v407_v46, %v406_v45  ;;  %v727_v50 = vpack.c.bf16 %v439_v49, %v438_v47  ;;  %vm182_vm2 = vcmask 1041409   ;;  %v442_v36 = vld [vmem:[#allocation8 + $0x1a0] sm:$0xff]  ;;  %v443_v37 = vld [vmem:[#allocation8 + $0x1a8] sm:$0xff]  ;;  %v412_v46 = vld [vmem:[#allocation8 + $0xb0] sm:$0xff] }
  0x41   :  { %618 = vmatprep.subr.msk.mxu0 %vm99_vm0, %v231_v43  ;;  %v152_v56 = vsub.s32 %v149_v52, %v971_v53  ;;  %vm184_vm3 = vcmask 1042434   ;;  %vm186_vm4 = vcmask 1043459   ;;  %vm188_vm5 = vcmask 1044484   ;;  %v394_v40 = vld [vmem:[#allocation8 + $0x20] sm:$0xff]  ;;  %v427_v45 = vld [vmem:[#allocation8 + $0x128] sm:$0xff]  ;;  %v413_v47 = vld [vmem:[#allocation8 + $0xb8] sm:$0xff] }
  0x42   :  { %621 = vmatprep.subr.msk.mxu1 %vm99_vm0, %v232_v44  ;;  %619 = vmatpush1.msk.msra.mxu0 %vm99_vm0, %v205_v41  ;;  %vm190_vm6 = vcmask 1045509   ;;  %vm192_vm7 = vcmask 1046534   ;;  %vm194_vm8 = vcmask 1047559   ;;  %v697_v25 = vpack.c.bf16 %v391_v17, %v390_v16  ;;  %v395_v41 = vld [vmem:[#allocation8 + $0x28] sm:$0xff]  ;;  %v426_v44 = vld [vmem:[#allocation8 + $0x120] sm:$0xff]  ;;  %v445_v49 = vld [vmem:[#allocation8 + $0x1b8] sm:$0xff] }
  0x43   :  { %622 = vmatpush1.msk.msra.mxu1 %vm99_vm0, %v206_v42  ;;  %696 = vmatprep.subr.bf16.mxu0 %v695_v48  ;;  %v729_v26 = vpack.c.bf16 %v423_v19, %v422_v18  ;;  %v699_v30 = vpack.c.bf16 %v409_v21, %v408_v20  ;;  %v731_v31 = vpack.c.bf16 %v441_v23, %v440_v22  ;;  %v444_v48 = vld [vmem:[#allocation8 + $0x1b0] sm:$0xff]  ;;  %v433_v18 = vld [vmem:[#allocation8 + $0x158] sm:$0xff]  ;;  %v418_v19 = vld [vmem:[#allocation8 + $0xe0] sm:$0xff] }
  0x44   :  { %123 = vadd.xlane.f32.xlu0 %v122_v32  ;;  %128 = vadd.xlane.f32.xlu1 %v127_v33  ;;  %v424_v32 = vld [vmem:[#allocation8 + $0x110] sm:$0xff]  ;;  %v425_v33 = vld [vmem:[#allocation8 + $0x118] sm:$0xff]  ;;  %v703_v42 = vpack.c.bf16 %v411_v35, %v410_v34  ;;  %v735_v43 = vpack.c.bf16 %v443_v37, %v442_v36  ;;  %v737_v51 = vpack.c.bf16 %v427_v45, %v426_v44  ;;  %v419_v20 = vld [vmem:[#allocation8 + $0xe8] sm:$0xff]  ;;  %v211_v45 = vsub.s32 0, %v971_v53 }
  0x45   :  { %728 = vmatprep.subr.bf16.mxu1 %v727_v50  ;;  %v705_v50 = vpack.c.bf16 %v395_v41, %v394_v40  ;;  %v396_v52 = vld [vmem:[#allocation8 + $0x30] sm:$0xff]  ;;  %v450_v21 = vld [vmem:[#allocation8 + $0x1e0] sm:$0xff]  ;;  %v451_v22 = vld [vmem:[#allocation8 + $0x1e8] sm:$0xff] }
  0x46   :  { %v66_v12 = vld [vmem:[#allocation2] sm:$0xff]  ;;  %v432_v17 = vld [vmem:[#allocation8 + $0x150] sm:$0xff]  ;;  %v421_v34 = vld [vmem:[#allocation8 + $0xf8] sm:$0xff] }
  0x47   :  { %v452_v35 = vld [vmem:[#allocation8 + $0x1f0] sm:$0xff]  ;;  %v453_v37 = vld [vmem:[#allocation8 + $0x1f8] sm:$0xff] }
  0x48   :  { %133 = vadd.xlane.f32.xlu0 %v132_v38  ;;  %138 = vadd.xlane.f32.xlu1 %v137_v39  ;;  %v701_v38 = vpack.c.bf16 %v393_v28, %v392_v27  ;;  %v733_v39 = vpack.c.bf16 %v425_v33, %v424_v32  ;;  %v402_v27 = vld [vmem:[#allocation8 + $0x60] sm:$0xff]  ;;  %v403_v28 = vld [vmem:[#allocation8 + $0x68] sm:$0xff]  ;;  %v420_v33 = vld [vmem:[#allocation8 + $0xf0] sm:$0xff]  ;;  %v755_v40 = vpack.c.bf16 %v453_v37, %v452_v35 }
  0x49   :  { %v723_v36 = vpack.c.bf16 %v421_v34, %v420_v33 }
  0xc9   :  { %v104_v54 = vpop.xlane.xlu0 %103  ;;  %v114_v55 = vpop.xlane.xlu1 %113 }
  0xca   :  { %v153_v59 = vrot.slane %v104_v54, %v152_v56  ;;  %v161_v62 = vrot.slane %v114_v55, %v152_v56  ;;  %v397_v54 = vld [vmem:[#allocation8 + $0x38] sm:$0xff]  ;;  %v707_v55 = vpack.c.bf16 %v413_v47, %v412_v46  ;;  %v219_v46 = vsub.s32 2, %v971_v53  ;;  %v207_v47 = vld [vmem:[%s1001_s2] sm:$0xf] }
  0xcd   :  { %v109_v57 = vpop.xlane.xlu0 %108  ;;  %v119_v58 = vpop.xlane.xlu1 %118 }
  0xce   :  { %v157_v60 = vrot.slane %v109_v57, %v152_v56  ;;  %v165_v61 = vrot.slane %v119_v58, %v152_v56  ;;  %v428_v57 = vld [vmem:[#allocation8 + $0x130] sm:$0xff]  ;;  %v429_v58 = vld [vmem:[#allocation8 + $0x138] sm:$0xff] }
  0xd0   :  { %v183_v63 = vsel %vm182_vm2, %v157_v60, %v153_v59  ;;  %v414_v59 = vld [vmem:[#allocation8 + $0xc0] sm:$0xff]  ;;  %v415_v60 = vld [vmem:[#allocation8 + $0xc8] sm:$0xff] }
  0xd1   :  { %v185_v0 = vsel %vm184_vm3, %v161_v62, %v183_v63  ;;  %v124_v1 = vpop.xlane.xlu0 %123  ;;  %v129_v2 = vpop.xlane.xlu1 %128  ;;  %v447_v62 = vld [vmem:[#allocation8 + $0x1c8] sm:$0xff]  ;;  %v709_v63 = vpack.c.bf16 %v397_v54, %v396_v52 }
  0xd2   :  { %v187_v3 = vsel %vm186_vm4, %v165_v61, %v185_v0  ;;  %v169_v4 = vrot.slane %v124_v1, %v152_v56  ;;  %v173_v5 = vrot.slane %v129_v2, %v152_v56  ;;  %v446_v61 = vld [vmem:[#allocation8 + $0x1c0] sm:$0xff]  ;;  %v741_v0 = vpack.c.bf16 %v429_v58, %v428_v57  ;;  %v399_v2 = vld [vmem:[#allocation8 + $0x48] sm:$0xff] }
  0xd3   :  { %v398_v1 = vld [vmem:[#allocation8 + $0x40] sm:$0xff] }
  0xd4   :  { %v189_v6 = vsel %vm188_vm5, %v169_v4, %v187_v3  ;;  %v711_v3 = vpack.c.bf16 %v415_v60, %v414_v59  ;;  %v743_v4 = vpack.c.bf16 %v447_v62, %v446_v61 }
  0xd5   :  { %v134_v7 = vpop.xlane.xlu0 %133  ;;  %v139_v8 = vpop.xlane.xlu1 %138  ;;  %v191_v11 = vsel %vm190_vm6, %v173_v5, %v189_v6  ;;  %v430_v5 = vld [vmem:[#allocation8 + $0x140] sm:$0xff]  ;;  %v431_v6 = vld [vmem:[#allocation8 + $0x148] sm:$0xff] }
  0xd6   :  { %v177_v9 = vrot.slane %v134_v7, %v152_v56  ;;  %v181_v10 = vrot.slane %v139_v8, %v152_v56  ;;  %v739_v56 = vpack.c.bf16 %v445_v49, %v444_v48  ;;  %v416_v7 = vld [vmem:[#allocation8 + $0xd0] sm:$0xff]  ;;  %v417_v8 = vld [vmem:[#allocation8 + $0xd8] sm:$0xff]  ;;  %v215_v48 = vsub.s32 1, %v971_v53 }
  0xd7   :  { %v223_v49 = vsub.s32 3, %v971_v53 }
  0xd8   :  { %v193_v13 = vsel %vm192_vm7, %v177_v9, %v191_v11  ;;  %v448_v9 = vld [vmem:[#allocation8 + $0x1d0] sm:$0xff]  ;;  %v713_v11 = vpack.c.bf16 %v399_v2, %v398_v1  ;;  %v216_v52 = vrot.slane %v207_v47, %v215_v48 }
  0xd9   :  { %v195_v14 = vsel %vm194_vm8, %v181_v10, %v193_v13  ;;  %v449_v10 = vld [vmem:[#allocation8 + $0x1d8] sm:$0xff]  ;;  %v400_v13 = vld [vmem:[#allocation8 + $0x50] sm:$0xff]  ;;  %v224_v54 = vrot.slane %v207_v47, %v223_v49 }
  0xda   :  { %v197_v15 = vadd.f32 %v195_v14, %v66_v12  ;;  %v745_v12 = vpack.c.bf16 %v431_v6, %v430_v5  ;;  %v401_v14 = vld [vmem:[#allocation8 + $0x58] sm:$0xff]  ;;  %v747_v16 = vpack.c.bf16 %v449_v10, %v448_v9 }
  0xdb   :  { %v717_v23 = vpack.c.bf16 %v401_v14, %v400_v13 }
  0xdc   :  { %199 = vst.msk [vmem:[#allocation2] sm:$0xff] %vm64_vm1, %v197_v15  ;;  %v715_v15 = vpack.c.bf16 %v417_v8, %v416_v7 }
  0xe3   :  { %v203_v24 = vld [vmem:[#allocation2] sm:$0xff] }
  0xe4   :  { %v204_v29 = vmul.f32 0.00390625, %v203_v24  ;;  %v749_v24 = vpack.c.bf16 %v433_v18, %v432_v17 }
  0xe6   :  { %620 = vmatmul.mubr.msk.f32.vlgmr.msra.gmra.mrb[0].mxu0 %vm64_vm1, %v204_v29  ;;  %623 = vmatmul.mubr.msk.f32.vlgmr.msra.gmra.mrb[0].mxu1 %vm64_vm1, %v204_v29  ;;  %v434_v29 = vld [vmem:[#allocation8 + $0x160] sm:$0xff] }
  0xe7   :  { %698 = vmatpush3.bf16.msra.mxu0 %v697_v25  ;;  %730 = vmatpush3.bf16.msra.mxu1 %v729_v26  ;;  %v719_v25 = vpack.c.bf16 %v419_v20, %v418_v19  ;;  %v751_v26 = vpack.c.bf16 %v451_v22, %v450_v21 }
  0xe8   :  { %700 = vmatprep.subr.bf16.mxu0 %v699_v30  ;;  %732 = vmatprep.subr.bf16.mxu1 %v731_v31  ;;  %v721_v30 = vpack.c.bf16 %v403_v28, %v402_v27  ;;  %v435_v31 = vld [vmem:[#allocation8 + $0x168] sm:$0xff] }
  0xe9   :  { %v753_v32 = vpack.c.bf16 %v435_v31, %v434_v29 }
  0xeb   :  { %702 = vmatpush3.bf16.msra.mxu0 %v701_v38  ;;  %734 = vmatpush3.bf16.msra.mxu1 %v733_v39  ;;  %v404_v38 = vld [vmem:[#allocation8 + $0x70] sm:$0xff]  ;;  %v405_v39 = vld [vmem:[#allocation8 + $0x78] sm:$0xff] }
  0xec   :  { %704 = vmatprep.subr.bf16.mxu0 %v703_v42  ;;  %736 = vmatprep.subr.bf16.mxu1 %v735_v43  ;;  %v725_v41 = vpack.c.bf16 %v405_v39, %v404_v38  ;;  %v436_v42 = vld [vmem:[#allocation8 + $0x170] sm:$0xff]  ;;  %v437_v43 = vld [vmem:[#allocation8 + $0x178] sm:$0xff] }
  0xed   :  { %v757_v44 = vpack.c.bf16 %v437_v43, %v436_v42 }
  0xef   :  { %706 = vmatpush3.bf16.msra.mxu0 %v705_v50  ;;  %738 = vmatpush3.bf16.msra.mxu1 %v737_v51  ;;  %v212_v50 = vrot.slane %v207_v47, %v211_v45  ;;  %v220_v51 = vrot.slane %v207_v47, %v219_v46 }
  0xf0   :  { %708 = vmatprep.subr.bf16.mxu0 %v707_v55  ;;  %740 = vmatprep.subr.bf16.mxu1 %v739_v56 }
  0xf3   :  { %710 = vmatpush3.bf16.msra.mxu0 %v709_v63  ;;  %742 = vmatpush3.bf16.msra.mxu1 %v741_v0 }
  0xf4   :  { %712 = vmatprep.subr.bf16.mxu0 %v711_v3  ;;  %744 = vmatprep.subr.bf16.mxu1 %v743_v4  ;;  %v624_v4 = vld [vmem:[%s1003_s4] ss:$0 sm:$0xff] }
  0xf7   :  { %714 = vmatpush3.bf16.msra.mxu0 %v713_v11  ;;  %746 = vmatpush3.bf16.msra.mxu1 %v745_v12 }
  0xf8   :  { %716 = vmatprep.subr.bf16.mxu0 %v715_v15  ;;  %748 = vmatprep.subr.bf16.mxu1 %v747_v16 }
  0xfb   :  { %718 = vmatpush3.bf16.msra.mxu0 %v717_v23  ;;  %750 = vmatpush3.bf16.msra.mxu1 %v749_v24 }
  0xfc   :  { %720 = vmatprep.subr.bf16.mxu0 %v719_v25  ;;  %752 = vmatprep.subr.bf16.mxu1 %v751_v26 }
  0xff   :  { %722 = vmatpush3.bf16.msra.mxu0 %v721_v30  ;;  %754 = vmatpush3.bf16.msra.mxu1 %v753_v32 }
 0x100   :  { %724 = vmatprep.subr.bf16.mxu0 %v723_v36  ;;  %756 = vmatprep.subr.bf16.mxu1 %v755_v40 }
 0x103   :  { %726 = vmatpush3.bf16.msra.mxu0 %v725_v41  ;;  %758 = vmatpush3.bf16.msra.mxu1 %v757_v44 }
 0x1b9   :  { %v310_v55 = vpop.f32.mrb[0].mxu0  ;;  %v381_v56 = vpop.f32.mrb[0].mxu1 }
 0x1ba   :  { %v311_v57 = vadd.f32 %v310_v55, %v212_v50  ;;  %v382_v58 = vadd.f32 %v381_v56, %v220_v51  ;;  %v312_v59 = vpop.f32.mrb[1].mxu0  ;;  %v383_v60 = vpop.f32.mrb[1].mxu1 }
 0x1bb   :  { %v313_v61 = vadd.f32 %v312_v59, %v216_v52  ;;  %v384_v62 = vadd.f32 %v383_v60, %v224_v54 }
 0x1bc   :  { %v386_v1 = vmax.f32 %v311_v57, 0.0  ;;  %v388_v2 = vmax.f32 %v382_v58, 0.0 }
 0x1bd   :  { %v387_v63 = vmax.f32 %v313_v61, 0.0  ;;  %v389_v0 = vmax.f32 %v384_v62, 0.0 }
 0x1bf   :  { %525 = vmatprep.mubr.f32.mxu0 %v387_v63  ;;  %595 = vmatprep.mubr.f32.mxu1 %v389_v0 }
 0x1c0   :  { %526 = vmatmul.mubr.f32.vlgmr.msra.gmra.mrb[2].mxu0 %v386_v1  ;;  %596 = vmatmul.mubr.f32.vlgmr.msra.gmra.mrb[2].mxu1 %v388_v2 }
 0x293   :  { %v657_v53 = vpop.f32.mrb[2].mxu0  ;;  %v692_v3 = vpop.f32.mrb[2].mxu1 }
 0x294   :  { %v658_v5 = vpop.f32.mrb[3].mxu0  ;;  %v693_v6 = vpop.f32.mrb[3].mxu1 }
 0x295   :  { %v659_v7 = vadd.f32 %v658_v5, %v657_v53  ;;  %v694_v8 = vadd.f32 %v693_v6, %v692_v3 }
 0x297   :  { %v528_v9 = vadd.f32 %v659_v7, %v624_v4 }
 0x299   :  { %v598_v10 = vadd.f32 %v694_v8, %v528_v9 }
 0x29b   :  { %601 = vst [vmem:[#allocation9] sm:$0xff] %v598_v10 }
 0x29c   :  { %853 = shalt.err (!%p850_p0)
}
 0x29d   :  { %s854_s4 = scalar_lea.hbm %s1004_s5, 128 }
 0x29e   :  { %p855_p1 = scmp.ne.s32.totalorder %s1004_s5, %s854_s4  ;;  %p858_p2 = scmp.lt.u32.totalorder %s854_s4, %s1004_s5 }
 0x2a0   :  { %p860_p3 = pnand %p858_p2, %p855_p1 }
 0x2a2   :  { %863 = shalt.err (!%p860_p3)
}
 0x2a3   :  { %611 = dma.vmem_to_hbm [thread:$0]  %s609_s7, 128, %s1004_s5, [#allocation5]  }
 0x2a4   :  { %868 = dma.done.wait [#allocation5], 128  }
 0x2a5   :  { %869 = vsyncadd [#allocation5], 4294967168 }
 0x2a6   :  { %615 = vsyncpa [#allocation4], 1 }
 0x2a7   :  { %616 = vsyncpa [#allocation7], 1 }
 0x2a8   :  { %617 = vsyncpa [#allocation5], 1 }

</bundles_post_ra>
